<compile_context>
chip_gen: v7x
topology: tpu7x:2x2x1
jax: 0.10.0
libtpu: 0.0.40
codegen_flags: <defaults>
</compile_context>

<pallas_src>
import functools

import jax
import jax.numpy as jnp
from jax import lax
from jax.experimental import pallas as pl
from jax.experimental.pallas import tpu as pltpu


def _round_up(x, m):
    return ((x + m - 1) // m) * m


# --------------------------------------------------------------- kernels ----

def _rpn_im2col_kernel(xcol_ref, w3t_ref, b3_ref, wht_ref, bh_ref, out_ref):
    """Tiny-Cin path.

    xcol_ref: (1, Kp, bm)   im2col'd input columns (channels-major)
    w3t_ref : (L, Kp)       fused 3x3 conv weight, transposed, zero-padded K
    b3_ref  : (L, 1)
    wht_ref : (HP, L)       fused cls|reg head weight (HP = 5A padded to 8)
    bh_ref  : (HP, 1)
    out_ref : (1, HP, bm)
    """
    t = jnp.dot(w3t_ref[...], xcol_ref[0], preferred_element_type=jnp.float32)
    t = jnp.maximum(t + b3_ref[...], 0.0)
    heads = jnp.dot(wht_ref[...], t.astype(wht_ref.dtype),
                    preferred_element_type=jnp.float32) + bh_ref[...]
    out_ref[0] = heads.astype(out_ref.dtype)


def _rpn_tiled_kernel(x_ref, w3_ref, b3_ref, wht_ref, bh_ref, out_ref, *, wp2):
    """Large-Cin path: halo'd row block, 9 shifted K=Cin matmuls, fused heads.

    x_ref  : (Sblk, Cp)  flattened (rows x (W+2), channels) NHWC slab w/ halo
    w3_ref : (9, Cp, L)  per-tap conv weights
    b3_ref : (1, L)
    wht_ref: (L, HP)
    bh_ref : (1, HP)
    out_ref: (m, HP)     m = bh_rows * (W+2) output positions, channel-minor
    """
    m = out_ref.shape[0]
    acc = None
    for dy in range(3):
        for dx in range(3):
            off = dy * wp2 + dx                      # static sublane offset
            v = x_ref[off:off + m, :]                # no reshape, no mask
            p = jnp.dot(v, w3_ref[dy * 3 + dx],
                        preferred_element_type=jnp.float32)
            acc = p if acc is None else acc + p
    t = jnp.maximum(acc + b3_ref[...], 0.0)          # f32 bias + ReLU
    heads = jnp.dot(t.astype(wht_ref.dtype), wht_ref[...],
                    preferred_element_type=jnp.float32) + bh_ref[...]
    out_ref[...] = heads.astype(out_ref.dtype)


# --------------------------------------------------- block-size selection ---

def _vmem_budget_and_limit():
    """Per-generation (working-set budget, vmem_limit_bytes)."""
    try:
        kind = jax.devices()[0].device_kind.lower()
    except Exception:
        kind = ""
    if "v5" in kind:
        return 10 << 20, 24 << 20        # 16 MiB default scoped, 128 MiB phys
    if "v6" in kind:
        return 20 << 20, 40 << 20        # 32 MiB default scoped, 128 MiB phys
    return 14 << 20, 32 << 20            # v7x / unknown: only 64 MiB physical


def _pick_bm_im2col(hw, batch, kp, hp, layer, itemsize, budget):
    """Spatial block (multiple of 128) for the im2col path, fully budgeted."""
    def est(bm):
        work = 2 * kp * bm * itemsize                       # input block x2
        work += 2 * hp * bm * 4                             # f32 output x2
        work += 2 * (layer * kp + hp * layer) * itemsize    # weights x2
        work += 2 * (layer + hp) * 4                        # biases
        work += (layer + hp) * bm * 4 + kp * bm * itemsize  # live values
        return work

    bm = min(4096, _round_up(hw, 128))
    while bm > 128 and est(bm) > budget:
        bm -= 128
    hwp = _round_up(hw, bm)
    # keep the number of parallel grid steps even (v7x has 2 TensorCores)
    if (batch * (hwp // bm)) % 2 == 1 and bm >= 256:
        bm = max(128, (bm // 2) // 128 * 128)
        hwp = _round_up(hw, bm)
    return bm, hwp


def _pick_bh_tiled(h, batch, wp2, cp, hp, layer, itemsize, budget):
    """Row-block height (multiple of 8) for the tiled path, fully budgeted."""
    def est(bh):
        m = bh * wp2
        sblk = _round_up((bh + 2) * wp2 + 2, 8)
        work = 2 * sblk * cp * itemsize                         # input slab x2
        work += 2 * m * hp * 4                                  # f32 output x2
        work += 2 * (9 * cp * layer + layer * hp) * itemsize    # weights x2
        work += 2 * m * layer * 4                               # acc + t (f32)
        work += m * cp * itemsize + m * hp * 4                  # tap + heads
        return work

    bh = min(64, _round_up(h, 8))
    while bh > 8 and est(bh) > budget:
        bh -= 8
    hpad = _round_up(h, bh)
    if (batch * (hpad // bh)) % 2 == 1 and bh >= 16:
        bh = max(8, (bh // 2) // 8 * 8)
        hpad = _round_up(h, bh)
    return bh, hpad


# ----------------------------------------------------------------- forward --

def rpn_forward(feature_map_nchw, params, *, compute_dtype=jnp.bfloat16,
                path="auto"):
    """RPN forward.

    feature_map_nchw: [B, Cin, H, W] float32 (PyTorch NCHW convention)
    params: w3 (3,3,Cin,L) HWIO, b3 (L,), wc (L,A), bc (A,), wr (L,4A), br (4A,)
    compute_dtype: MXU input dtype (default bf16; accumulation is always f32).
    path: "auto" | "im2col" | "tiled"
    Returns (classification_op [B*H*W*A], regression_op [B*H*W*A, 4]).
    """
    B, Cin, H, W = feature_map_nchw.shape
    w3, b3 = params["w3"], params["b3"]
    wc, bc = params["wc"], params["bc"]
    wr, br = params["wr"], params["br"]
    L = w3.shape[-1]
    A = wc.shape[-1]
    HP = _round_up(5 * A, 8)                     # fused head rows, 8-padded
    itemsize = jnp.dtype(compute_dtype).itemsize
    kmult = 16 if itemsize < 4 else 8            # contraction padding multiple
    budget, vmem_limit = _vmem_budget_and_limit()

    if path == "auto":
        path = "im2col" if 9 * Cin <= 72 else "tiled"

    # fused cls|reg 1x1 head, zero-padded to HP output channels
    wh = jnp.concatenate([wc, wr], axis=1)                       # (L, 5A)
    bhead = jnp.concatenate([bc, br])                            # (5A,)

    if path == "im2col":
        # --- tiny-Cin path: wrapper im2col (9x dup is fine for tiny Cin) ----
        HW = H * W
        K = 9 * Cin
        Kp = _round_up(K, kmult)
        bm, HWp = _pick_bm_im2col(HW, B, Kp, HP, L, itemsize, budget)

        x = feature_map_nchw.astype(compute_dtype)
        x_pad = jnp.pad(x, ((0, 0), (0, 0), (1, 1), (1, 1)))
        taps = [x_pad[:, :, dy:dy + H, dx:dx + W]
                for dy in range(3) for dx in range(3)]           # 9x(B,Cin,H,W)
        x_col = jnp.stack(taps, axis=1).reshape(B, K, HW)
        x_col = jnp.pad(x_col, ((0, 0), (0, Kp - K), (0, HWp - HW)))

        w3t = jnp.pad(w3.reshape(K, L), ((0, Kp - K), (0, 0))).T  # (L, Kp)
        w3t = w3t.astype(compute_dtype)
        whtT = jnp.pad(wh, ((0, 0), (0, HP - 5 * A))).T           # (HP, L)
        whtT = whtT.astype(compute_dtype)
        b3c = b3.reshape(L, 1).astype(jnp.float32)
        bhc = jnp.pad(bhead, (0, HP - 5 * A)).reshape(HP, 1).astype(jnp.float32)

        out = pl.pallas_call(
            _rpn_im2col_kernel,
            out_shape=jax.ShapeDtypeStruct((B, HP, HWp), jnp.float32),
            grid_spec=pltpu.PrefetchScalarGridSpec(
                num_scalar_prefetch=0,
                grid=(B, HWp // bm),
                in_specs=[
                    # NOTE: bump to pipeline_mode=pl.Buffered(3) only if a
                    # profile shows exposed DMA on this stream.
                    pl.BlockSpec((1, Kp, bm), lambda b, j: (b, 0, j)),
                    pl.BlockSpec((L, Kp), lambda b, j: (0, 0)),
                    pl.BlockSpec((L, 1), lambda b, j: (0, 0)),
                    pl.BlockSpec((HP, L), lambda b, j: (0, 0)),
                    pl.BlockSpec((HP, 1), lambda b, j: (0, 0)),
                ],
                out_specs=pl.BlockSpec((1, HP, bm), lambda b, j: (b, 0, j)),
            ),
            compiler_params=pltpu.CompilerParams(
                dimension_semantics=("parallel", "parallel"),
                vmem_limit_bytes=vmem_limit),
        )(x_col, w3t, b3c, whtT, bhc)

        valid = out[:, :5 * A, :HW]                               # (B, 5A, HW)
        cls = jnp.transpose(valid[:, :A, :], (0, 2, 1)).reshape(-1)
        reg = jnp.transpose(valid[:, A:, :], (0, 2, 1)).reshape(-1, 4)
        return cls, reg

    # --- large-Cin path: halo'd row blocks, ~1x HBM read traffic ------------
    Wp2 = W + 2
    Cp = _round_up(Cin, kmult)
    bh_rows, Hp = _pick_bh_tiled(H, B, Wp2, Cp, HP, L, itemsize, budget)
    nblk = Hp // bh_rows
    m = bh_rows * Wp2
    Sblk = _round_up((bh_rows + 2) * Wp2 + 2, 8)

    # NHWC, zero-pad spatially (+1 each side; extra rows up to Hp), pad
    # channels to Cp, flatten (rows, W+2), then gather overlapping row windows
    # (only the 2-row halo is duplicated, not 9x the input).
    x_nhwc = jnp.transpose(feature_map_nchw, (0, 2, 3, 1)).astype(compute_dtype)
    x_p = jnp.pad(x_nhwc, ((0, 0), (1, Hp - H + 1), (1, 1), (0, Cp - Cin)))
    xf = x_p.reshape(B, (Hp + 2) * Wp2, Cp)
    need = (nblk - 1) * bh_rows * Wp2 + Sblk
    xf = jnp.pad(xf, ((0, 0), (0, need - (Hp + 2) * Wp2), (0, 0)))
    win = (jnp.arange(nblk) * (bh_rows * Wp2))[:, None] + jnp.arange(Sblk)[None, :]
    x_blk = xf[:, win, :]                                  # (B, nblk, Sblk, Cp)

    w3t = jnp.pad(w3.reshape(9, Cin, L), ((0, 0), (0, Cp - Cin), (0, 0)))
    w3t = w3t.astype(compute_dtype)                        # (9, Cp, L)
    whp = jnp.pad(wh, ((0, 0), (0, HP - 5 * A))).astype(compute_dtype)  # (L, HP)
    b3r = b3.reshape(1, L).astype(jnp.float32)
    bhr = jnp.pad(bhead, (0, HP - 5 * A)).reshape(1, HP).astype(jnp.float32)

    out = pl.pallas_call(
        functools.partial(_rpn_tiled_kernel, wp2=Wp2),
        out_shape=jax.ShapeDtypeStruct((B, Hp * Wp2, HP), jnp.float32),
        grid_spec=pltpu.PrefetchScalarGridSpec(
            num_scalar_prefetch=0,
            grid=(B, nblk),
            in_specs=[
                pl.BlockSpec((None, None, Sblk, Cp), lambda b, i: (b, i, 0, 0)),
                pl.BlockSpec((9, Cp, L), lambda b, i: (0, 0, 0)),
                pl.BlockSpec((1, L), lambda b, i: (0, 0)),
                pl.BlockSpec((L, HP), lambda b, i: (0, 0)),
                pl.BlockSpec((1, HP), lambda b, i: (0, 0)),
            ],
            out_specs=pl.BlockSpec((None, m, HP), lambda b, i: (b, i, 0)),
        ),
        compiler_params=pltpu.CompilerParams(
            dimension_semantics=("parallel", "parallel"),
            vmem_limit_bytes=vmem_limit),
    )(x_blk, w3t, b3r, whp, bhr)

    # Output is already NHWC (spatial-major, channel-minor): just drop the
    # padded rows/cols/channels.  Matches permute(0,2,3,1) + flatten/reshape.
    out4 = out.reshape(B, Hp, Wp2, HP)[:, :H, :W, :5 * A]
    cls = out4[..., :A].reshape(-1)
    reg = out4[..., A:].reshape(-1, 4)
    return cls, reg


# ------------------------------------------------------------- utilities ----

def init_params(key, input_size, layer_size, conv_size, num_anchor):
    """Deterministic init: normal(std=0.01) weights, zero biases (as in torch).

    Stored in the layouts this kernel consumes: w3 HWIO (3,3,Cin,L),
    wc/wr (L, out).  When porting real PyTorch state_dicts convert conv
    weights OIHW -> HWIO and the 1x1 heads (out, L, 1, 1) -> (L, out).
    """
    assert conv_size == 3, "kernel implements the module's 3x3 + pad=1 conv"
    k1, k2, k3 = jax.random.split(key, 3)
    w3 = 0.01 * jax.random.normal(k1, (3, 3, input_size, layer_size), jnp.float32)
    wc = 0.01 * jax.random.normal(k2, (layer_size, num_anchor), jnp.float32)
    wr = 0.01 * jax.random.normal(k3, (layer_size, 4 * num_anchor), jnp.float32)
    return {
        "w3": w3, "b3": jnp.zeros((layer_size,), jnp.float32),
        "wc": wc, "bc": jnp.zeros((num_anchor,), jnp.float32),
        "wr": wr, "br": jnp.zeros((4 * num_anchor,), jnp.float32),
    }


def _reference_forward(x_nchw, params):
    """Pure-JAX (XLA) reference for validation."""
    t = lax.conv_general_dilated(
        x_nchw, params["w3"], window_strides=(1, 1), padding=((1, 1), (1, 1)),
        dimension_numbers=("NCHW", "HWIO", "NCHW"))
    t = jax.nn.relu(t + params["b3"][None, :, None, None])
    t_nhwc = jnp.transpose(t, (0, 2, 3, 1))
    cls = t_nhwc @ params["wc"] + params["bc"]
    reg = t_nhwc @ params["wr"] + params["br"]
    return cls.reshape(-1), reg.reshape(-1, 4)


if __name__ == "__main__":
    B, Cin, H, W = 2, 4, 16, 16
    layer_size, conv_size, num_anchor = 32, 3, 3

    key = jax.random.PRNGKey(0)
    k_x, k_p = jax.random.split(key)
    feature_map = jax.random.normal(k_x, (B, Cin, H, W), jnp.float32)
    params = init_params(k_p, Cin, layer_size, conv_size, num_anchor)

    cls_ref, reg_ref = _reference_forward(feature_map, params)

    # f32, tiny-Cin im2col path (exact layout/order check).
    cls_op, reg_op = rpn_forward(feature_map, params,
                                 compute_dtype=jnp.float32, path="im2col")
    cls_op, reg_op = jax.block_until_ready((cls_op, reg_op))
    assert cls_op.shape == (B * H * W * num_anchor,)
    assert reg_op.shape == (B * H * W * num_anchor, 4)
    assert jnp.allclose(cls_op, cls_ref, atol=1e-5, rtol=1e-4)
    assert jnp.allclose(reg_op, reg_ref, atol=1e-5, rtol=1e-4)

    # f32, tiled/halo path (the large-Cin route) forced at small shapes so it
    # is exercised and exactly checked too.
    cls_t, reg_t = rpn_forward(feature_map, params,
                               compute_dtype=jnp.float32, path="tiled")
    cls_t, reg_t = jax.block_until_ready((cls_t, reg_t))
    assert jnp.allclose(cls_t, cls_ref, atol=1e-5, rtol=1e-4)
    assert jnp.allclose(reg_t, reg_ref, atol=1e-5, rtol=1e-4)

    # default (auto path, bf16 MXU inputs, f32 accumulation).
    cls_bf, reg_bf = rpn_forward(feature_map, params)
    cls_bf, reg_bf = jax.block_until_ready((cls_bf, reg_bf))
    assert jnp.allclose(cls_bf, cls_ref, atol=3e-3, rtol=5e-2)
    assert jnp.allclose(reg_bf, reg_ref, atol=3e-3, rtol=5e-2)

    # bf16 + tiled path (the realistic large-Cin configuration).
    cls_tb, reg_tb = rpn_forward(feature_map, params, path="tiled")
    cls_tb, reg_tb = jax.block_until_ready((cls_tb, reg_tb))
    assert jnp.allclose(cls_tb, cls_ref, atol=3e-3, rtol=5e-2)
    assert jnp.allclose(reg_tb, reg_ref, atol=3e-3, rtol=5e-2)

    print("KERNEL_OK")
</pallas_src>

<mosaic_0001>
module attributes {stable_mosaic.version = 11 : i64} {
  func.func @_rpn_im2col_kernel(%arg0: i32, %arg1: i32, %arg2: memref<1x40x256xf32, #tpu.memory_space<vmem>>, %arg3: memref<32x40xf32, #tpu.memory_space<vmem>>, %arg4: memref<32x1xf32, #tpu.memory_space<vmem>>, %arg5: memref<16x32xf32, #tpu.memory_space<vmem>>, %arg6: memref<16x1xf32, #tpu.memory_space<vmem>>, %arg7: memref<1x16x256xf32, #tpu.memory_space<vmem>>) attributes {dimension_semantics = [#tpu.dimension_semantics<parallel>, #tpu.dimension_semantics<parallel>], iteration_bounds = array<i64: 2, 1>, scalar_prefetch = 0 : i64, scratch_operands = 0 : i64, tpu.core_type = #tpu.core_type<tc>, window_params = [{transform_indices = @transform_0, window_bounds = array<i64: 1, 40, 256>}, {pipeline_mode = #tpu.pipeline_mode<synchronous>, transform_indices = @transform_1, window_bounds = array<i64: 32, 40>}, {pipeline_mode = #tpu.pipeline_mode<synchronous>, transform_indices = @transform_2, window_bounds = array<i64: 32, 1>}, {pipeline_mode = #tpu.pipeline_mode<synchronous>, transform_indices = @transform_3, window_bounds = array<i64: 16, 32>}, {pipeline_mode = #tpu.pipeline_mode<synchronous>, transform_indices = @transform_4, window_bounds = array<i64: 16, 1>}, {transform_indices = @transform_5, window_bounds = array<i64: 1, 16, 256>}]} {
    %c0 = arith.constant 0 : index
    %c0_0 = arith.constant 0 : index
    %0 = vector.load %arg3[%c0, %c0_0] : memref<32x40xf32, #tpu.memory_space<vmem>>, vector<32x40xf32>
    %c0_1 = arith.constant 0 : index
    %c0_2 = arith.constant 0 : index
    %c0_3 = arith.constant 0 : index
    %1 = vector.load %arg2[%c0_1, %c0_2, %c0_3] : memref<1x40x256xf32, #tpu.memory_space<vmem>>, vector<1x40x256xf32>
    %2 = vector.shape_cast %1 : vector<1x40x256xf32> to vector<40x256xf32>
    %cst = arith.constant dense<0.000000e+00> : vector<32x256xf32>
    %3 = tpu.matmul %0, %2, %cst {dimension_numbers = #tpu.dot_dimension_numbers<[1], [0], [0], [1], [0, 0, 1, 1], [], []>} : vector<32x40xf32>, vector<40x256xf32>, vector<32x256xf32> -> vector<32x256xf32>
    %c0_4 = arith.constant 0 : index
    %c0_5 = arith.constant 0 : index
    %4 = vector.load %arg4[%c0_4, %c0_5] : memref<32x1xf32, #tpu.memory_space<vmem>>, vector<32x1xf32>
    %5 = vector.broadcast %4 : vector<32x1xf32> to vector<32x256xf32>
    %6 = arith.addf %3, %5 : vector<32x256xf32>
    %cst_6 = arith.constant 0.000000e+00 : f32
    %7 = vector.broadcast %cst_6 : f32 to vector<32x256xf32>
    %8 = arith.maximumf %6, %7 : vector<32x256xf32>
    %c0_7 = arith.constant 0 : index
    %c0_8 = arith.constant 0 : index
    %9 = vector.load %arg5[%c0_7, %c0_8] : memref<16x32xf32, #tpu.memory_space<vmem>>, vector<16x32xf32>
    %cst_9 = arith.constant dense<0.000000e+00> : vector<16x256xf32>
    %10 = tpu.matmul %9, %8, %cst_9 {dimension_numbers = #tpu.dot_dimension_numbers<[1], [0], [0], [1], [0, 0, 1, 1], [], []>} : vector<16x32xf32>, vector<32x256xf32>, vector<16x256xf32> -> vector<16x256xf32>
    %c0_10 = arith.constant 0 : index
    %c0_11 = arith.constant 0 : index
    %11 = vector.load %arg6[%c0_10, %c0_11] : memref<16x1xf32, #tpu.memory_space<vmem>>, vector<16x1xf32>
    %12 = vector.broadcast %11 : vector<16x1xf32> to vector<16x256xf32>
    %13 = arith.addf %10, %12 : vector<16x256xf32>
    %c0_12 = arith.constant 0 : index
    %c0_13 = arith.constant 0 : index
    %c0_14 = arith.constant 0 : index
    %14 = vector.load %arg7[%c0_12, %c0_13, %c0_14] : memref<1x16x256xf32, #tpu.memory_space<vmem>>, vector<1x16x256xf32>
    %15 = vector.shape_cast %14 : vector<1x16x256xf32> to vector<16x256xf32>
    %16 = vector.shape_cast %13 : vector<16x256xf32> to vector<1x16x256xf32>
    tpu.vector_store %arg7[%c0_12, %c0_13, %c0_14], %16 {strides = array<i32>} : memref<1x16x256xf32, #tpu.memory_space<vmem>>, vector<1x16x256xf32>,
    return
  }
  func.func @transform_0(%arg0: i32, %arg1: i32) -> (i32, i32, i32) {
    %c0_i32 = arith.constant 0 : i32
    %c0_i32_0 = arith.constant 0 : i32
    return %arg0, %c0_i32, %arg1 : i32, i32, i32
  }
  func.func @transform_1(%arg0: i32, %arg1: i32) -> (i32, i32) {
    %c0_i32 = arith.constant 0 : i32
    %c0_i32_0 = arith.constant 0 : i32
    %c0_i32_1 = arith.constant 0 : i32
    return %c0_i32, %c0_i32_0 : i32, i32
  }
  func.func @transform_2(%arg0: i32, %arg1: i32) -> (i32, i32) {
    %c0_i32 = arith.constant 0 : i32
    %c0_i32_0 = arith.constant 0 : i32
    %c0_i32_1 = arith.constant 0 : i32
    return %c0_i32, %c0_i32_0 : i32, i32
  }
  func.func @transform_3(%arg0: i32, %arg1: i32) -> (i32, i32) {
    %c0_i32 = arith.constant 0 : i32
    %c0_i32_0 = arith.constant 0 : i32
    %c0_i32_1 = arith.constant 0 : i32
    return %c0_i32, %c0_i32_0 : i32, i32
  }
  func.func @transform_4(%arg0: i32, %arg1: i32) -> (i32, i32) {
    %c0_i32 = arith.constant 0 : i32
    %c0_i32_0 = arith.constant 0 : i32
    %c0_i32_1 = arith.constant 0 : i32
    return %c0_i32, %c0_i32_0 : i32, i32
  }
  func.func @transform_5(%arg0: i32, %arg1: i32) -> (i32, i32, i32) {
    %c0_i32 = arith.constant 0 : i32
    %c0_i32_0 = arith.constant 0 : i32
    return %arg0, %c0_i32, %arg1 : i32, i32, i32
  }
}

</mosaic_0001>

<bundles_post_ra>
// kernel: tpu_custom_call.1
= control target key start
LH: loop header
LB: loop body
LE: loop exit
PB: predicated region body
PF: predicated region fallthrough
CT: control target
= control target key end

     0   :  { %10 = vsyncpa [#allocation3], 0  ;;  %s1110_s0 = inlined_call_operand.hbm [shape: f32[2,40,256], index: 0, kind: input, shape index: {}]   ;;  %s1111_s1 = inlined_call_operand.vmem [shape: f32[32,40], index: 1, kind: input, shape index: {}]   ;;  %s1112_s2 = inlined_call_operand.vmem [shape: f32[32,1], index: 2, kind: input, shape index: {}]   ;;  %s1113_s3 = inlined_call_operand.vmem [shape: f32[16,32], index: 3, kind: input, shape index: {}]   ;;  %s1114_s4 = inlined_call_operand.vmem [shape: f32[16,1], index: 4, kind: input, shape index: {}]   ;;  %s1115_s5 = inlined_call_operand.hbm [shape: f32[2,16,256], index: 5, kind: output, shape index: {}]  }
   0x1   :  { %12 = vsyncpa [#allocation3 + $0x1], 0 }
   0x2   :  { %13 = vsyncpa [#allocation4], 0 }
   0x3   :  { %15 = vsyncpa [#allocation4 + $0x1], 0  ;;  %s876_s18 = smov 0   ;;  %s878_s19 = smov 0  }
   0x4   :  { %s880_s20 = smov 0   ;;  %s882_s21 = smov 0  }
   0x5   :  { %s884_s22 = smov 0   ;;  %s886_s23 = smov 0  }
   0x6 LB: > { %s616_s24 = sadd.s32 4294967295, %s836_s23   ;;  %s617_s25 = sadd.s32 4294967294, %s836_s23   ;;  %s836_s23 = sphi %s886_s23, %s21_s23   ;;  %s832_s22 = sphi %s884_s22, %s1130_s22   ;;  %s828_s21 = sphi %s882_s21, %s1129_s21   ;;  %s824_s20 = sphi %s880_s20, %s1128_s20   ;;  %s820_s19 = sphi %s878_s19, %s1127_s19   ;;  %s816_s18 = sphi %s876_s18, %s1126_s18  }
   0x7   : > { %s33_s26 = sadd.s32 1, %s832_s22  ;;  %s42_s27 = sadd.s32 1, %s824_s20 }
   0x8   : > { %p35_p0 = scmp.ge.s32.totalorder %s33_s26, 2  ;;  %p49_p1 = scmp.ne.s32.totalorder %s824_s20, %s820_s19 }
   0x9   : > { %p50_p2 = scmp.eq.s32.totalorder %s836_s23, 0  ;;  %p55_p3 = scmp.ne.s32.totalorder %s820_s19, %s816_s18 }
   0xa   : > { %s1132_s26 = smov (%p35_p0, %s33_s26), 0  ;;  %p56_p5 = scmp.eq.s32.totalorder %s616_s24, 0 }
   0xb   : > { %p917_p4 = por %p50_p2, %p49_p1  ;;  %s37_s29 = ssub.s32 %s832_s22, %s1132_s26 }
   0xc   : > { %p165_p6 = scmp.eq.s32.totalorder %s616_s24, 1  ;;  %p40_p7 = scmp.eq.s32.totalorder %s37_s29, 0 }
   0xd   : > { %p923_p8 = por %p56_p5, %p55_p3  ;;  %p171_p10 = scmp.eq.s32.totalorder %s617_s25, 1 }
   0xe   : > { %p927_p9 = por %p165_p6, %p49_p1  ;;  %p666_p13 = scmp.lt.s32.totalorder %s836_s23, 2 }
   0xf   : > { %s932_s7 = scalar_select %p40_p7, %s824_s20, %s42_s27  }
  0x10   : > { %s1119_s6 = scalar_select %p927_p9, 1, 0 }
  0x11   : > { %p934_p11 = por %p171_p10, %p55_p3  ;;  %s203_s9 = sand.u32 1, %s824_s20  }
  0x12   : > { %s651_s10 = smul.u32 80, %s203_s9  ;;  %p944_p0 = pnand %p666_p13, %p917_p4 }
  0x13   : > { %s1120_s8 = scalar_select %p934_p11, 1, 0 }
  0x14   : > { %s652_s11 = smul.u32 1280, %s832_s22  ;;  %s207_s16 = scalar_lea.vmem [#allocation2], %s651_s10 }
  0x15   : > { %s216_s17 = sshll.u32 %s207_s16, 4  ;;  %s956_s24 = scalar_lea.sflag [#allocation3], %s203_s9  ;;  %s953_s17 = int_to_ptr.vmem [resolvable:$true] %s216_s17 }
  0x16   : > { %s951_s15 = scalar_lea.hbm %s1110_s0, %s652_s11  ;;  %p726_p3 = pneg %p944_p0 }
  0x17   : > { %s724_s25 = scalar_lea.hbm %s951_s15, 1280  ;;  %s729_s29 = scalar_lea.hbm %s1110_s0, 2560 }
  0x18   : > { %p725_p2 = scmp.ne.s32.totalorder %s951_s15, %s724_s25  ;;  %p730_p6 = scmp.lt.u32.totalorder %s951_s15, %s1110_s0 }
  0x19   : > { %p731_p7 = scmp.lt.u32.totalorder %s729_s29, %s724_s25  ;;  %p733_p13 = scmp.lt.u32.totalorder %s724_s25, %s951_s15 }
  0x1a   : > { %p727_p4 = pnand %p726_p3, %p725_p2 }
  0x1b   : > { %p732_p10 = por %p731_p7, %p730_p6 }
  0x1c   : > { %p728_p5 = pneg %p727_p4 }
  0x1d   : > { %p734_p12 = por %p733_p13, %p732_p10 }
  0x1f   : > { %p735_p1 = pnand %p734_p12, %p728_p5 }
  0x21   : > { %738 = shalt.err (!%p735_p1)
}
  0x22   : > { %s739_s9 = scalar_lea.vmem %s953_s17, 1280  ;;  %s838_s13 = smov [#allocation2]  }
  0x23   : > { %p740_p2 = scmp.ne.s32.totalorder %s953_s17, %s739_s9  ;;  %s744_s14 = sshll.u32 %s838_s13, 4  ;;  %s745_s14 = int_to_ptr.vmem [resolvable:$false] %s744_s14 }
  0x24   : > { %s746_s16 = scalar_lea.vmem %s745_s14, 2560  ;;  %p747_p9 = scmp.lt.s32.totalorder %s953_s17, %s745_s14 }
  0x25   : > { %p742_p4 = pnand %p740_p2, %p726_p3  ;;  %p748_p6 = scmp.lt.s32.totalorder %s746_s16, %s739_s9 }
  0x27   : > { %p743_p11 = pneg %p742_p4  ;;  %p749_p7 = por %p748_p6, %p747_p9 }
  0x29   : > { %p750_p10 = pnand %p749_p7, %p743_p11 }
  0x2b   : > { %753 = shalt.err (!%p750_p10)
}
  0x2c   : > { %s839_s25 = smov 256   ;;  %s840_s27 = smov 16  }
  0x2d   : > { %661 = dma.hbm_to_vmem [thread:$0]  (!%p944_p0), %s951_s15, 1280, %s953_s17, %s956_s24, %s839_s25, %s839_s25, %s840_s27  }
  0x2e   : > { %p224_p12 = scmp.lt.s32.totalorder %s836_s23, 3  ;;  %p1122_p1 = scmp.ge.s32.totalorder %s836_s23, 1 }
  0x30   : > { %p225_p3 = pnand %p1122_p1, %p224_p12 }
  0x31   : > { %s988_s28 = sand.u32 (!%p225_p3), 1, %s820_s19  }
  0x32   : > { %228 = sbr.rel (%p225_p3) target bundleno = 540 (0x21c), region = 40  ;;  %s231_s11 = scalar_lea.sflag (!%p225_p3), [#allocation3], %s988_s28 }
  0x33   : > { %s653_s29 = smul.u32 (!%p225_p3), 80, %s988_s28 }
  0x35   : > { %s992_s10 = scalar_lea.vmem (!%p225_p3), [#allocation2], %s653_s29 }
  0x39   : > { %807 = dma.done.wait (%p923_p8), %s231_s11, 1280  }
  0x3a   : > { %809 = vsyncadd (%p923_p8), %s231_s11, 4294966016  ;;  %v841_v0 = vmov 0.0   ;;  %v842_v1 = vmov 0   ;;  %v268_v2 = vld [vmem:[%s992_s10 + $0x8] sm:$0xff]  ;;  %v270_v3 = vld [vmem:[%s992_s10 + $0x18] sm:$0xff]  ;;  %vm301_vm0 = vcmask 326656  }
  0x3b   : > { %378 = vmatprep.mubr.f32.mxu0 %v841_v0  ;;  %722 = vset.pattern.permute.xlu0 %v842_v1  ;;  %v267_v4 = vld [vmem:[%s992_s10] sm:$0xff]  ;;  %v635_v5 = vpack.c.bf16 %v270_v3, %v268_v2  ;;  %v269_v6 = vld [vmem:[%s992_s10 + $0x10] sm:$0xff]  ;;  %v272_v7 = vld [vmem:[%s992_s10 + $0x28] sm:$0xff]  ;;  %vm425_vm1 = vcmask 261120   ;;  %s622_s27 = sshll.u32 %s988_s28, 5  ;;  %s634_s30 = sshll.u32 %s828_s21, 9 }
  0x3c   : > { %723 = vset.pattern.permute.xlu1 %v842_v1  ;;  %496 = vmatprep.mubr.f32.mxu1 %v841_v0  ;;  %v274_v8 = vld [vmem:[%s992_s10 + $0x38] sm:$0xff]  ;;  %v637_v9 = vpack.c.bf16 %v269_v6, %v267_v4  ;;  %v271_v11 = vld [vmem:[%s992_s10 + $0x20] sm:$0xff]  ;;  %v273_v12 = vld [vmem:[%s992_s10 + $0x30] sm:$0xff]  ;;  %s260_s29 = scalar_lea.vmem [#allocation5], %s622_s27  ;;  %s1061_s15 = scalar_lea.hbm %s1115_s5, %s634_s30 }
  0x3d   : > { %v639_v10 = vpack.c.bf16 %v274_v8, %v272_v7  ;;  %636 = vmatprep.subr.bf16.mxu0 %v635_v5  ;;  %v641_v13 = vpack.c.bf16 %v273_v12, %v271_v11  ;;  %v277_v14 = vld [vmem:[%s1112_s2] sm:$0xff]  ;;  %v279_v15 = vld [vmem:[%s1112_s2 + $0x10] sm:$0xff]  ;;  %v276_v16 = vld [vmem:[%s992_s10 + $0x48] sm:$0xff]  ;;  %s529_s11 = sshll.u32 %s260_s29, 4  ;;  %s514_s21 = scalar_lea.sflag [#allocation4], %s988_s28  ;;  %s1056_s11 = int_to_ptr.vmem [resolvable:$true] %s529_s11 }
  0x3e   : > { %638 = vmatpush1.bf16.msra.mxu0 %v637_v9  ;;  %283 = vperm.xlu0 %722, %v277_v14   ;;  %v278_v17 = vld [vmem:[%s1112_s2 + $0x8] sm:$0xff]  ;;  %v280_v18 = vld [vmem:[%s1112_s2 + $0x18] sm:$0xff]  ;;  %v275_v19 = vld [vmem:[%s992_s10 + $0x40] sm:$0xff]  ;;  %s754_s17 = scalar_lea.vmem %s1056_s11, 512  ;;  %p1123_p9 = scmp.ne.s32.totalorder %s1119_s6, 0 }
  0x3f   : > { %640 = vmatprep.subr.bf16.mxu0 %v639_v10  ;;  %293 = vperm.xlu1 %723, %v279_v15   ;;  %v263_v20 = vld [vmem:[%s1111_s1] sm:$0xff]  ;;  %v414_v22 = vld [vmem:[%s1114_s4 + $0x8] sm:$0xff]  ;;  %v265_v24 = vld [vmem:[%s1111_s1 + $0x10] sm:$0xff]  ;;  %p755_p8 = scmp.ne.s32.totalorder %s1056_s11, %s754_s17  ;;  %s843_s24 = smov [#allocation5]  }
  0x40   : > { %v413_v21 = vld [vmem:[%s1114_s4] sm:$0xff]  ;;  %v264_v23 = vld [vmem:[%s1111_s1 + $0x8] sm:$0xff]  ;;  %v266_v25 = vld [vmem:[%s1111_s1 + $0x18] sm:$0xff]  ;;  %s758_s9 = sshll.u32 %s843_s24, 4  ;;  %s759_s9 = int_to_ptr.vmem [resolvable:$false] %s758_s9 }
  0x41   : > { %v411_v58 = vld [vmem:[%s1113_s3] sm:$0xff]  ;;  %v412_v59 = vld [vmem:[%s1113_s3 + $0x8] sm:$0xff]  ;;  %p756_p11 = pnand %p755_p8, %p1123_p9  ;;  %s760_s13 = scalar_lea.vmem %s759_s9, 1024 }
  0x42   : > { %642 = vmatpush1.bf16.msra.mxu0 %v641_v13  ;;  %288 = vperm.xlu0 %722, %v278_v17   ;;  %p761_p5 = scmp.lt.s32.totalorder %s1056_s11, %s759_s9  ;;  %p762_p13 = scmp.lt.s32.totalorder %s760_s13, %s754_s17 }
  0x43   : > { %322 = vmatprep.subr.mxu0 %v276_v16  ;;  %298 = vperm.xlu1 %723, %v280_v18   ;;  %p757_p0 = pneg %p756_p11 }
  0x44   : > { %p763_p2 = por %p762_p13, %p761_p5 }
  0x46   : > { %323 = vmatpush1.msra.mxu0 %v275_v19  ;;  %417 = vperm.xlu0 %722, %v413_v21   ;;  %p764_p4 = pnand %p763_p2, %p757_p0 }
  0x47   : > { %623 = vmatmul.mubr.msk.f32.vlgmr.msra.gmra.mrb[0].mxu0 %vm301_vm0, %v263_v20  ;;  %422 = vperm.xlu1 %723, %v414_v22  }
  0x48   : > { %384 = vmatprep.mubr.f32.mxu0 %v841_v0 }
  0x4b   : > { %624 = vmatmul.mubr.msk.f32.gmra.mrb[2].mxu0 %vm301_vm0, %v264_v23 }
  0x4c   : > { %390 = vmatprep.mubr.f32.mxu0 %v841_v0 }
  0x4f   : > { %625 = vmatmul.mubr.msk.f32.gmra.mrb[4].mxu0 %vm301_vm0, %v265_v24 }
  0x50   : > { %396 = vmatprep.mubr.f32.mxu0 %v841_v0 }
  0x53   : > { %626 = vmatmul.mubr.msk.f32.gmra.mrb[6].mxu0 %vm301_vm0, %v266_v25 }
  0xbd   : > { %v284_v26 = vpop.permute.xlu0 %283 }
  0xbe   : > { %v294_v35 = vpop.permute.xlu1 %293 }
  0xc1   : > { %v289_v30 = vpop.permute.xlu0 %288 }
  0xc2   : > { %v299_v46 = vpop.permute.xlu1 %298 }
  0xc5   : > { %v418_v60 = vpop.permute.xlu0 %417 }
  0xc6   : > { %v423_v2 = vpop.permute.xlu1 %422 }
 0x11a   : > { %v380_v27 = vpop.f32.mrb[0].mxu0 }
 0x11b   : > { %v382_v28 = vpop.f32.mrb[1].mxu0  ;;  %v381_v29 = vadd.f32 %v380_v27, %v284_v26 }
 0x11c   : > { %v383_v31 = vadd.f32 %v382_v28, %v284_v26 }
 0x11d   : > { %v403_v37 = vmax.f32 %v381_v29, 0.0 }
 0x11e   : > { %v386_v32 = vpop.f32.mrb[2].mxu0  ;;  %v404_v39 = vmax.f32 %v383_v31, 0.0 }
 0x11f   : > { %v387_v33 = vadd.f32 %v386_v32, %v289_v30  ;;  %v388_v34 = vpop.f32.mrb[3].mxu0 }
 0x120   : > { %v389_v36 = vadd.f32 %v388_v34, %v289_v30 }
 0x121   : > { %v405_v38 = vmax.f32 %v387_v33, 0.0 }
 0x122   : > { %v406_v40 = vmax.f32 %v389_v36, 0.0  ;;  %v392_v41 = vpop.f32.mrb[4].mxu0 }
 0x123   : > { %v394_v42 = vpop.f32.mrb[5].mxu0  ;;  %v645_v43 = vpack.c.bf16 %v405_v38, %v403_v37  ;;  %v393_v45 = vadd.f32 %v392_v41, %v294_v35 }
 0x124   : > { %v643_v44 = vpack.c.bf16 %v406_v40, %v404_v39  ;;  %v395_v47 = vadd.f32 %v394_v42, %v294_v35 }
 0x125   : > { %v407_v52 = vmax.f32 %v393_v45, 0.0 }
 0x126   : > { %v398_v48 = vpop.f32.mrb[6].mxu0  ;;  %644 = vmatprep.subr.bf16.mxu1 %v643_v44  ;;  %v408_v54 = vmax.f32 %v395_v47, 0.0 }
 0x127   : > { %v399_v49 = vadd.f32 %v398_v48, %v299_v46  ;;  %v400_v50 = vpop.f32.mrb[7].mxu0  ;;  %646 = vmatpush1.bf16.msra.mxu1 %v645_v43 }
 0x128   : > { %v401_v51 = vadd.f32 %v400_v50, %v299_v46 }
 0x129   : > { %v409_v53 = vmax.f32 %v399_v49, 0.0 }
 0x12a   : > { %v410_v55 = vmax.f32 %v401_v51, 0.0 }
 0x12b   : > { %v649_v56 = vpack.c.bf16 %v409_v53, %v407_v52 }
 0x12c   : > { %v647_v57 = vpack.c.bf16 %v410_v55, %v408_v54 }
 0x12e   : > { %648 = vmatprep.subr.bf16.mxu1 %v647_v57 }
 0x12f   : > { %650 = vmatpush1.bf16.msra.mxu1 %v649_v56 }
 0x132   : > { %627 = vmatmul.mubr.msk.f32.vlgmr.msra.gmra.mrb[0].mxu1 %vm425_vm1, %v411_v58 }
 0x133   : > { %502 = vmatprep.mubr.f32.mxu1 %v841_v0 }
 0x136   : > { %628 = vmatmul.mubr.msk.f32.gmra.mrb[2].mxu1 %vm425_vm1, %v412_v59 }
 0x205   : > { %v498_v61 = vpop.f32.mrb[0].mxu1 }
 0x206   : > { %v499_v62 = vadd.f32 %v498_v61, %v418_v60  ;;  %v500_v63 = vpop.f32.mrb[1].mxu1 }
 0x207   : > { %v501_v1 = vadd.f32 %v500_v63, %v418_v60 }
 0x208   : > { %509 = vst [vmem:[%s260_s29] sm:$0xff] %v499_v62 }
 0x209   : > { %510 = vst [vmem:[%s260_s29 + $0x8] sm:$0xff] %v501_v1  ;;  %v504_v0 = vpop.f32.mrb[2].mxu1 }
 0x20a   : > { %v505_v3 = vadd.f32 %v504_v0, %v423_v2  ;;  %v506_v4 = vpop.f32.mrb[3].mxu1 }
 0x20b   : > { %v507_v5 = vadd.f32 %v506_v4, %v423_v2 }
 0x20c   : > { %511 = vst [vmem:[%s260_s29 + $0x10] sm:$0xff] %v505_v3 }
 0x20d   : > { %512 = vst [vmem:[%s260_s29 + $0x18] sm:$0xff] %v507_v5 }
 0x20e   : > { %767 = shalt.err (!%p764_p4)
}
 0x20f   : > { %s768_s14 = scalar_lea.hbm %s1061_s15, 512  ;;  %s772_s27 = scalar_lea.hbm %s1115_s5, 1024 }
 0x210   : > { %p769_p6 = scmp.ne.s32.totalorder %s1061_s15, %s768_s14  ;;  %p773_p12 = scmp.lt.u32.totalorder %s1061_s15, %s1115_s5 }
 0x211   : > { %p774_p1 = scmp.lt.u32.totalorder %s772_s27, %s768_s14  ;;  %p776_p8 = scmp.lt.u32.totalorder %s768_s14, %s1061_s15 }
 0x212   : > { %p770_p7 = pnand %p769_p6, %p1123_p9 }
 0x213   : > { %p775_p3 = por %p774_p1, %p773_p12 }
 0x214   : > { %p771_p10 = pneg %p770_p7 }
 0x215   : > { %p777_p11 = por %p776_p8, %p775_p3 }
 0x217   : > { %p778_p0 = pnand %p777_p11, %p771_p10 }
 0x219   : > { %781 = shalt.err (!%p778_p0)
}
 0x21a   : > { %s844_s10 = smov 256   ;;  %s845_s12 = smov 16  }
 0x21b   : > { %656 = dma.vmem_to_hbm [thread:$0]  (%p1123_p9), %s1056_s11, 512, %s1061_s15, %s514_s21, %s844_s10, %s844_s10, %s845_s12  }
 0x21c PF: > { %s544_s17 = sand.u32 1, %s816_s18   ;;  %p1124_p5 = scmp.ne.s32.totalorder %s1120_s8, 0 }
 0x21d   : > { %p1125_p13 = scmp.ge.s32.totalorder %s836_s23, 2  ;;  %s545_s24 = scalar_lea.sflag [#allocation4], %s544_s17 }
 0x21f   : > { %p663_p2 = pnand %p1125_p13, %p1124_p5 }
 0x221   : > { %811 = dma.done.wait (!%p663_p2), %s545_s24, 512  }
 0x222   : > { %813 = vsyncadd (!%p663_p2), %s545_s24, 4294966784  ;;  %s21_s23 = sadd.s32 1, %s836_s23   ;;  %s1126_s18 = smov %s820_s19 }
 0x223   : > { %p18_p4 = scmp.ge.s32.totalorder %s21_s23, 4   ;;  %s1127_s19 = smov %s824_s20 }
 0x224   : > { %s1128_s20 = smov %s932_s7  ;;  %s1129_s21 = smov %s832_s22 }
 0x225   : > { %s1130_s22 = smov %s1132_s26  ;;  %20 = sbr.rel (!%p18_p4) target bundleno = 6 (0x6), region = 85 }
 0x22c   :  { %550 = vsyncpa [#allocation3], 1 }
 0x22d   :  { %552 = vsyncpa [#allocation3 + $0x1], 1 }
 0x22e   :  { %553 = vsyncpa [#allocation4], 1 }
 0x22f   :  { %555 = vsyncpa [#allocation4 + $0x1], 1 }

</bundles_post_ra>
